<compile_context>
chip_gen: v6e
topology: v6e:2x2x1
jax: 0.10.0
libtpu: 0.0.40
codegen_flags: <defaults>
</compile_context>

<pallas_src>
import functools

import jax
import jax.numpy as jnp
from jax.experimental import pallas as pl
from jax.experimental.pallas import tpu as pltpu

_LANE = 128
_SUBLANE_BY_ITEMSIZE = {8: 8, 4: 8, 2: 16, 1: 32}
_MIB = 1024 * 1024


def _relu_squared_kernel(x_ref, o_ref):
    x = x_ref[...]
    r = jnp.maximum(x, jnp.zeros_like(x))
    o_ref[...] = r * r


def _relu_squared_jnp(x):
    # Single fused XLA elementwise pass; already at HBM roofline for small /
    # ragged inputs where pallas_call fixed overhead or extra passes dominate.
    r = jnp.maximum(x, jnp.zeros_like(x))
    return r * r


@functools.lru_cache(maxsize=1)
def _tpu_params():
    """Returns (vmem_capacity_bytes, has_two_tensorcores) for the local device."""
    kind = ""
    try:
        kind = (getattr(jax.devices()[0], "device_kind", "") or "").lower()
    except Exception:
        pass
    vmem = None
    try:
        vmem = int(pltpu.get_tpu_info().vmem_capacity_bytes)
    except Exception:
        vmem = None
    if vmem is None:
        # v7x has 64 MiB VMEM per TensorCore; earlier generations have 128 MiB.
        vmem = (64 if ("v7" in kind or "7x" in kind) else 128) * _MIB
    # Megacore (2 TensorCores sharing the grid): v7x (and v4/v5p).
    multi_tc = any(t in kind for t in ("v7", "7x", "v4", "v5p"))
    return vmem, multi_tc


def _gen_block_params(target_block_bytes):
    vmem, multi_tc = _tpu_params()
    if target_block_bytes is None:
        if vmem >= 100 * _MIB:          # v5e / v6e / v5p / v4: 128 MiB physical VMEM
            target_block_bytes = 12 * _MIB
        else:                           # v7x: 64 MiB per TensorCore
            target_block_bytes = 8 * _MIB
    # Double-buffered in+out footprint is 4 x block; leave headroom for compiler
    # scratch and never exceed ~3/4 of physical VMEM.
    vmem_limit = min(4 * target_block_bytes + 16 * _MIB, (vmem * 3) // 4)
    return target_block_bytes, vmem_limit, multi_tc


def relu_squared(
    x: jax.Array,
    *,
    target_block_bytes: int | None = None,
    min_pallas_bytes: int = 2 * _MIB,
    donate: bool = False,
) -> jax.Array:
    # TODO(synk): PyTorch's `inplace=True` has no meaning under JAX's functional
    # semantics; `donate=True` (+ donating the buffer at the jit boundary) is the
    # closest analogue via input_output_aliases. Integer dtypes may overflow on
    # squaring, matching the behavior of the original op on float activations.
    orig_shape = x.shape
    dtype = x.dtype
    n = x.size
    if n == 0:
        return x

    itemsize = jnp.dtype(dtype).itemsize
    n_bytes = n * itemsize

    # Small-input fast path: fixed pallas_call overhead dominates below ~2 MiB.
    if n_bytes < min_pallas_bytes:
        return _relu_squared_jnp(x)

    # Ragged total element count: a padded copy + slice would each be a full
    # extra HBM pass (~3x traffic), so let XLA do the single fused pass instead.
    if n % _LANE != 0:
        return _relu_squared_jnp(x)

    sublane = _SUBLANE_BY_ITEMSIZE.get(itemsize, 8)
    target_block_bytes, vmem_limit, multi_tc = _gen_block_params(target_block_bytes)

    # Flatten (contiguous reshape = metadata only) and view as a lane-dense 2D
    # slab (rows, width) with width a multiple of 128 dividing n -> unmasked,
    # fully contiguous DMAs, no padding of narrow trailing dims.
    m = n // _LANE
    g_cap = min(256, max(1, m // 8))
    g = 1
    for cand in range(g_cap, 0, -1):
        if m % cand == 0:
            g = cand
            break
    width = _LANE * g
    rows = n // width
    x2 = x.reshape(rows, width)

    # Row tile sized by bytes (generation-aware), sublane-granular. A ragged
    # last row block is masked by Pallas — no padded copy of the input.
    tile_r = (target_block_bytes // (width * itemsize)) // sublane * sublane
    tile_r = max(tile_r, sublane)
    if tile_r >= rows:
        if multi_tc and rows > sublane:
            # Two blocks so the "parallel" grid axis can shard across both TCs.
            half = -(-rows // 2)
            tile_r = min(-(-half // sublane) * sublane, rows)
        else:
            # Single-TC chip: one full-array block (full-dim block is exempt
            # from the sublane-multiple rule); avoids an extra grid step.
            tile_r = rows

    grid = (pl.cdiv(rows, tile_r),)

    cost = pl.CostEstimate(
        flops=2 * n,
        transcendentals=0,
        bytes_accessed=2 * n_bytes,
    )

    out = pl.pallas_call(
        _relu_squared_kernel,
        out_shape=jax.ShapeDtypeStruct((rows, width), dtype),
        grid_spec=pltpu.PrefetchScalarGridSpec(
            num_scalar_prefetch=0,
            grid=grid,
            in_specs=[pl.BlockSpec((tile_r, width), lambda i: (i, 0))],
            out_specs=pl.BlockSpec((tile_r, width), lambda i: (i, 0)),
        ),
        compiler_params=pltpu.CompilerParams(
            dimension_semantics=("parallel",),
            vmem_limit_bytes=vmem_limit,
        ),
        cost_estimate=cost,
        input_output_aliases=({0: 0} if donate else {}),
    )(x2)

    return out.reshape(orig_shape)


if __name__ == "__main__":
    key = jax.random.PRNGKey(0)
    k0, k1, k2, k3 = jax.random.split(key, 4)

    # Primary test: NCHW-like decoder activation (small -> jnp fast path).
    x = jax.random.normal(k0, (2, 4, 16, 16), dtype=jnp.float32)
    y = relu_squared(x)
    jax.block_until_ready(y)
    y_ref = jnp.maximum(x, 0.0) ** 2
    assert y.shape == x.shape and y.dtype == x.dtype
    assert jnp.allclose(y, y_ref, atol=1e-6, rtol=1e-6)

    # Force the Pallas path on the same shape (min_pallas_bytes=0).
    y_p = relu_squared(x, min_pallas_bytes=0)
    jax.block_until_ready(y_p)
    assert jnp.allclose(y_p, y_ref, atol=1e-6, rtol=1e-6)

    # Multi-block Pallas path with a masked ragged last row block (503 rows,
    # 256-row tiles) — exercises the no-pad ragged handling.
    x_big = jax.random.normal(k3, (503, 128), dtype=jnp.float32)
    y_big = relu_squared(x_big, min_pallas_bytes=0, target_block_bytes=128 * 1024)
    jax.block_until_ready(y_big)
    assert jnp.allclose(y_big, jnp.maximum(x_big, 0.0) ** 2, atol=1e-6, rtol=1e-6)

    # Ragged total element count -> pure-jnp fallback (no pad/slice HBM passes).
    x_odd = jax.random.normal(k1, (3, 5, 7), dtype=jnp.float32)
    y_odd = relu_squared(x_odd, min_pallas_bytes=0)
    jax.block_until_ready(y_odd)
    assert jnp.allclose(y_odd, jnp.maximum(x_odd, 0.0) ** 2, atol=1e-6, rtol=1e-6)

    # bf16 Pallas path (dtype-aware sublane handling).
    x_bf = jax.random.normal(k2, (2, 4, 16, 16), dtype=jnp.float32).astype(jnp.bfloat16)
    y_bf = relu_squared(x_bf, min_pallas_bytes=0)
    jax.block_until_ready(y_bf)
    assert y_bf.dtype == jnp.bfloat16
    assert jnp.allclose(
        y_bf.astype(jnp.float32),
        (jnp.maximum(x_bf, 0) ** 2).astype(jnp.float32),
        atol=1e-2, rtol=1e-2,
    )

    print("KERNEL_OK")
</pallas_src>

<mosaic_0001>
module attributes {stable_mosaic.version = 11 : i64} {
  func.func @_relu_squared_kernel(%arg0: i32, %arg1: memref<8x256xf32, #tpu.memory_space<vmem>>, %arg2: memref<8x256xf32, #tpu.memory_space<vmem>>) attributes {dimension_semantics = [#tpu.dimension_semantics<parallel>], iteration_bounds = array<i64: 1>, scalar_prefetch = 0 : i64, scratch_operands = 0 : i64, tpu.core_type = #tpu.core_type<tc>, window_params = [{transform_indices = @transform_0, window_bounds = array<i64: 8, 256>}, {transform_indices = @transform_1, window_bounds = array<i64: 8, 256>}]} {
    %c0 = arith.constant 0 : index
    %c0_0 = arith.constant 0 : index
    %0 = vector.load %arg1[%c0, %c0_0] : memref<8x256xf32, #tpu.memory_space<vmem>>, vector<8x256xf32>
    %cst = arith.constant 0.000000e+00 : f32
    %1 = vector.broadcast %cst : f32 to vector<8x256xf32>
    %2 = arith.maximumf %0, %1 : vector<8x256xf32>
    %3 = arith.mulf %2, %2 : vector<8x256xf32>
    %c0_1 = arith.constant 0 : index
    %c0_2 = arith.constant 0 : index
    %4 = vector.load %arg2[%c0_1, %c0_2] : memref<8x256xf32, #tpu.memory_space<vmem>>, vector<8x256xf32>
    tpu.vector_store %arg2[%c0_1, %c0_2], %3 {strides = array<i32>} : memref<8x256xf32, #tpu.memory_space<vmem>>, vector<8x256xf32>,
    return
  }
  func.func @transform_0(%arg0: i32) -> (i32, i32) {
    %c0_i32 = arith.constant 0 : i32
    %c0_i32_0 = arith.constant 0 : i32
    return %arg0, %c0_i32 : i32, i32
  }
  func.func @transform_1(%arg0: i32) -> (i32, i32) {
    %c0_i32 = arith.constant 0 : i32
    %c0_i32_0 = arith.constant 0 : i32
    return %arg0, %c0_i32 : i32, i32
  }
}

</mosaic_0001>

<bundles_post_ra>
// kernel: tpu_custom_call.1
= control target key start
LH: loop header
LB: loop body
LE: loop exit
PB: predicated region body
PF: predicated region fallthrough
CT: control target
= control target key end

     0   :  { %6 = vsyncpa [#allocation3], 0  ;;  %s108_s0 = inlined_call_operand.hbm [shape: f32[8,256], index: 0, kind: input, shape index: {}]   ;;  %s109_s1 = inlined_call_operand.hbm [shape: f32[8,256], index: 1, kind: output, shape index: {}]  }
   0x1   :  { %7 = vsyncpa [#allocation4], 0  ;;  %s90_s6 = smov [#allocation2]  }
   0x2   :  { %s14_s7 = sshll.u32 %s90_s6, 4  ;;  %s15_s7 = int_to_ptr.vmem [resolvable:$true] %s14_s7 }
   0x3   :  { %s54_s8 = scalar_lea.vmem %s15_s7, 256  ;;  %p59_p1 = scmp.lt.s32.totalorder %s15_s7, %s15_s7 }
   0x4   :  { %p55_p0 = scmp.ne.s32.totalorder %s15_s7, %s54_s8  ;;  %p60_p2 = scmp.lt.s32.totalorder %s54_s8, %s54_s8 }
   0x6   :  { %p61_p3 = por %p60_p2, %p59_p1 }
   0x8   :  { %p62_p4 = pnand %p61_p3, %p55_p0 }
   0xa   :  { %65 = shalt.err (!%p62_p4)
}
   0xb   :  { %17 = dma.hbm_to_vmem [thread:$0]  %s108_s0, 256, %s15_s7, [#allocation3]  }
   0xc   :  { %86 = dma.done.wait [#allocation3], 256  }
   0xd   :  { %87 = vsyncadd [#allocation3], 4294967040  ;;  %v21_v0 = vld [vmem:[#allocation2] sm:$0xff]  ;;  %v22_v1 = vld [vmem:[#allocation2 + $0x8] sm:$0xff]  ;;  %s91_s11 = smov [#allocation5]  }
   0xe   :  { %s35_s12 = sshll.u32 %s91_s11, 4  ;;  %v23_v2 = vmax.f32 %v21_v0, 0.0  ;;  %v24_v3 = vmax.f32 %v22_v1, 0.0  ;;  %s36_s12 = int_to_ptr.vmem [resolvable:$true] %s35_s12 }
   0xf   :  { %s66_s13 = scalar_lea.vmem %s36_s12, 256  ;;  %p71_p6 = scmp.lt.s32.totalorder %s36_s12, %s36_s12 }
  0x10   :  { %v25_v4 = vmul.f32 %v23_v2, %v23_v2  ;;  %v26_v5 = vmul.f32 %v24_v3, %v24_v3  ;;  %p67_p5 = scmp.ne.s32.totalorder %s36_s12, %s66_s13  ;;  %p72_p7 = scmp.lt.s32.totalorder %s66_s13, %s66_s13 }
  0x12   :  { %27 = vst [vmem:[#allocation5] sm:$0xff] %v25_v4  ;;  %28 = vst [vmem:[#allocation5 + $0x8] sm:$0xff] %v26_v5  ;;  %p73_p8 = por %p72_p7, %p71_p6 }
  0x14   :  { %p74_p9 = pnand %p73_p8, %p67_p5 }
  0x16   :  { %77 = shalt.err (!%p74_p9)
}
  0x17   :  { %38 = dma.vmem_to_hbm [thread:$0]  %s36_s12, 256, %s109_s1, [#allocation4]  }
  0x18   :  { %88 = dma.done.wait [#allocation4], 256  }
  0x19   :  { %89 = vsyncadd [#allocation4], 4294967040 }
  0x1a   :  { %42 = vsyncpa [#allocation3], 1 }
  0x1b   :  { %43 = vsyncpa [#allocation4], 1 }

</bundles_post_ra>
